<compile_context>
chip_gen: v5e
topology: v5e:2x2
jax: 0.10.0
libtpu: 0.0.40
codegen_flags: <defaults>
</compile_context>

<pallas_src>
import jax
import jax.numpy as jnp
from jax.experimental import pallas as pl
from jax.experimental.pallas import tpu as pltpu


def _make_kernel(B, Cin, Cout, H, W):
    Hp, Wp = H + 2, W + 2
    HW = H * W
    BCin, BCout = B * Cin, B * Cout

    def conv1x1_sum_kernel(x_ref, w_ref, b_ref, o_ref):
        # x_ref: (B*Cin, H*W)        unpadded input, pixels on lanes
        # w_ref: (B*Cout, B*Cin)     block-diagonal fused (W1 + W2_dense)
        # b_ref: (B*Cout, 1)         fused bias, tiled over batch
        # o_ref: (B*Cout, Hp*Wp)     padded output, pixels on lanes
        bias = b_ref[...]                                        # (BCout, 1)

        # Zero-padded input + 1x1 conv => border of the padded output is
        # exactly the bias.  Initialize everything to bias, then overwrite
        # the interior.  (Broadcast hoisted, done once.)
        o_ref[...] = jnp.broadcast_to(bias, (BCout, Hp * Wp))

        x = x_ref[...]                                           # (BCin, HW)
        wmat = w_ref[...]                                        # (BCout, BCin)

        # Unrolled VPU broadcast-MAC; MXU is skipped on purpose (K = M = 4).
        acc = jnp.broadcast_to(bias, (BCout, HW))                # hoisted bias
        for k in range(BCin):
            xk = jnp.broadcast_to(x[k:k + 1, :], (BCout, HW))    # sublane bcast
            acc = acc + wmat[:, k:k + 1] * xk                    # lane bcast * vec

        # Store interior rows of the padded output (static slices).
        for h in range(H):
            start = (1 + h) * Wp + 1
            o_ref[:, start:start + W] = acc[:, h * W:(h + 1) * W]

    return conv1x1_sum_kernel


def _dense_weights(w1, w2, groups):
    """w1: (Cout,Cin,1,1) dense conv; w2: (Cout,Cin//groups,1,1) grouped conv.
    Returns dense (Cout,Cin) matrices for both."""
    cout1, cin = w1.shape[0], w1.shape[1]
    cout2 = w2.shape[0]
    assert cin % groups == 0 and cout2 % groups == 0
    cin_g = cin // groups
    cout_g = cout2 // groups
    w1_d = w1[:, :, 0, 0]
    w2_d = jnp.zeros((cout2, cin), dtype=w2.dtype)
    for g in range(groups):
        w2_d = w2_d.at[g * cout_g:(g + 1) * cout_g,
                       g * cin_g:(g + 1) * cin_g].set(
            w2[g * cout_g:(g + 1) * cout_g, :, 0, 0])
    return w1_d, w2_d


def model_forward(x_nchw, w1, b1, w2, b2):
    B, Cin, H, W = x_nchw.shape
    Cout = w1.shape[0]
    Hp, Wp = H + 2, W + 2

    # Algebraic fusion: v1 + v2 == x @ (W1 + W2_dense) + (b1 + b2).
    w1_d, w2_d = _dense_weights(w1, w2, groups=2)
    w_sum = (w1_d + w2_d).astype(jnp.float32)                    # (Cout, Cin)
    b_sum = (b1 + b2).astype(jnp.float32)                        # (Cout,)

    # Fold batch into sublanes: block-diagonal weight / tiled bias.
    w_bd = jnp.kron(jnp.eye(B, dtype=jnp.float32), w_sum)        # (B*Cout, B*Cin)
    b_bd = jnp.tile(b_sum, B).reshape(B * Cout, 1)               # (B*Cout, 1)

    x_flat = x_nchw.astype(jnp.float32).reshape(B * Cin, H * W)  # free reshape, no pad

    kernel = _make_kernel(B, Cin, Cout, H, W)
    out_flat = pl.pallas_call(
        kernel,
        out_shape=jax.ShapeDtypeStruct((B * Cout, Hp * Wp), jnp.float32),
        grid_spec=pl.GridSpec(
            grid=(1,),
            in_specs=[
                pl.BlockSpec((B * Cin, H * W), lambda i: (0, 0)),
                pl.BlockSpec((B * Cout, B * Cin), lambda i: (0, 0)),
                pl.BlockSpec((B * Cout, 1), lambda i: (0, 0)),
            ],
            out_specs=pl.BlockSpec((B * Cout, Hp * Wp), lambda i: (0, 0)),
        ),
        compiler_params=pltpu.CompilerParams(
            dimension_semantics=("arbitrary",)),
    )(x_flat, w_bd, b_bd)

    return out_flat.reshape(B, Cout, Hp, Wp)                     # already NCHW


def reference_forward(x_nchw, w1, b1, w2, b2):
    """Pure-JAX reference (same math, no Pallas, no fusion)."""
    w1_d, w2_d = _dense_weights(w1, w2, groups=2)
    xp = jnp.pad(x_nchw, ((0, 0), (0, 0), (1, 1), (1, 1)))
    v1 = jnp.einsum('bchw,oc->bohw', xp, w1_d) + b1[None, :, None, None]
    v2 = jnp.einsum('bchw,oc->bohw', xp, w2_d) + b2[None, :, None, None]
    return v1 + v2


if __name__ == "__main__":
    key = jax.random.PRNGKey(0)
    kx, k1, k2, k3, k4 = jax.random.split(key, 5)

    B, Cin, H, W = 2, 4, 16, 16
    Cout, groups = 4, 2

    x = jax.random.normal(kx, (B, Cin, H, W), dtype=jnp.float32)
    w1 = 0.1 * jax.random.normal(k1, (Cout, Cin, 1, 1), dtype=jnp.float32)
    b1 = 0.1 * jax.random.normal(k2, (Cout,), dtype=jnp.float32)
    w2 = 0.1 * jax.random.normal(k3, (Cout, Cin // groups, 1, 1), dtype=jnp.float32)
    b2 = 0.1 * jax.random.normal(k4, (Cout,), dtype=jnp.float32)

    out = jax.jit(model_forward)(x, w1, b1, w2, b2)
    out = jax.block_until_ready(out)

    ref = reference_forward(x, w1, b1, w2, b2)
    assert out.shape == (B, Cout, H + 2, W + 2), out.shape
    assert jnp.allclose(out, ref, atol=1e-5, rtol=1e-5), "mismatch vs reference"

    print("KERNEL_OK")
</pallas_src>

<mosaic_0001>
module attributes {stable_mosaic.version = 11 : i64} {
  func.func @conv1x1_sum_kernel(%arg0: i32, %arg1: memref<8x256xf32, #tpu.memory_space<vmem>>, %arg2: memref<8x8xf32, #tpu.memory_space<vmem>>, %arg3: memref<8x1xf32, #tpu.memory_space<vmem>>, %arg4: memref<8x324xf32, #tpu.memory_space<vmem>>) attributes {dimension_semantics = [#tpu.dimension_semantics<arbitrary>], iteration_bounds = array<i64: 1>, scalar_prefetch = 0 : i64, scratch_operands = 0 : i64, tpu.core_type = #tpu.core_type<tc>, window_params = [{pipeline_mode = #tpu.pipeline_mode<synchronous>, transform_indices = @transform_0, window_bounds = array<i64: 8, 256>}, {pipeline_mode = #tpu.pipeline_mode<synchronous>, transform_indices = @transform_1, window_bounds = array<i64: 8, 8>}, {pipeline_mode = #tpu.pipeline_mode<synchronous>, transform_indices = @transform_2, window_bounds = array<i64: 8, 1>}, {pipeline_mode = #tpu.pipeline_mode<synchronous>, transform_indices = @transform_3, window_bounds = array<i64: 8, 324>}]} {
    %c0 = arith.constant 0 : index
    %c0_0 = arith.constant 0 : index
    %0 = vector.load %arg3[%c0, %c0_0] : memref<8x1xf32, #tpu.memory_space<vmem>>, vector<8x1xf32>
    %1 = vector.shape_cast %0 : vector<8x1xf32> to vector<8x1xf32>
    %2 = vector.broadcast %1 : vector<8x1xf32> to vector<8x324xf32>
    %c0_1 = arith.constant 0 : index
    %c0_2 = arith.constant 0 : index
    %3 = vector.load %arg4[%c0_1, %c0_2] : memref<8x324xf32, #tpu.memory_space<vmem>>, vector<8x324xf32>
    tpu.vector_store %arg4[%c0_1, %c0_2], %2 {strides = array<i32>} : memref<8x324xf32, #tpu.memory_space<vmem>>, vector<8x324xf32>,
    %c0_3 = arith.constant 0 : index
    %c0_4 = arith.constant 0 : index
    %4 = vector.load %arg1[%c0_3, %c0_4] : memref<8x256xf32, #tpu.memory_space<vmem>>, vector<8x256xf32>
    %c0_5 = arith.constant 0 : index
    %c0_6 = arith.constant 0 : index
    %5 = vector.load %arg2[%c0_5, %c0_6] : memref<8x8xf32, #tpu.memory_space<vmem>>, vector<8x8xf32>
    %6 = vector.shape_cast %0 : vector<8x1xf32> to vector<8x1xf32>
    %7 = vector.broadcast %6 : vector<8x1xf32> to vector<8x256xf32>
    %8 = vector.extract_strided_slice %4 {offsets = [0, 0], sizes = [1, 256], strides = [1, 1]} : vector<8x256xf32> to vector<1x256xf32>
    %9 = vector.shape_cast %8 : vector<1x256xf32> to vector<1x256xf32>
    %10 = vector.broadcast %9 : vector<1x256xf32> to vector<8x256xf32>
    %11 = vector.extract_strided_slice %5 {offsets = [0, 0], sizes = [8, 1], strides = [1, 1]} : vector<8x8xf32> to vector<8x1xf32>
    %12 = vector.broadcast %11 : vector<8x1xf32> to vector<8x256xf32>
    %13 = arith.mulf %12, %10 : vector<8x256xf32>
    %14 = arith.addf %7, %13 : vector<8x256xf32>
    %15 = vector.extract_strided_slice %4 {offsets = [1, 0], sizes = [1, 256], strides = [1, 1]} : vector<8x256xf32> to vector<1x256xf32>
    %16 = vector.shape_cast %15 : vector<1x256xf32> to vector<1x256xf32>
    %17 = vector.broadcast %16 : vector<1x256xf32> to vector<8x256xf32>
    %18 = vector.extract_strided_slice %5 {offsets = [0, 1], sizes = [8, 1], strides = [1, 1]} : vector<8x8xf32> to vector<8x1xf32>
    %19 = vector.broadcast %18 : vector<8x1xf32> to vector<8x256xf32>
    %20 = arith.mulf %19, %17 : vector<8x256xf32>
    %21 = arith.addf %14, %20 : vector<8x256xf32>
    %22 = vector.extract_strided_slice %4 {offsets = [2, 0], sizes = [1, 256], strides = [1, 1]} : vector<8x256xf32> to vector<1x256xf32>
    %23 = vector.shape_cast %22 : vector<1x256xf32> to vector<1x256xf32>
    %24 = vector.broadcast %23 : vector<1x256xf32> to vector<8x256xf32>
    %25 = vector.extract_strided_slice %5 {offsets = [0, 2], sizes = [8, 1], strides = [1, 1]} : vector<8x8xf32> to vector<8x1xf32>
    %26 = vector.broadcast %25 : vector<8x1xf32> to vector<8x256xf32>
    %27 = arith.mulf %26, %24 : vector<8x256xf32>
    %28 = arith.addf %21, %27 : vector<8x256xf32>
    %29 = vector.extract_strided_slice %4 {offsets = [3, 0], sizes = [1, 256], strides = [1, 1]} : vector<8x256xf32> to vector<1x256xf32>
    %30 = vector.shape_cast %29 : vector<1x256xf32> to vector<1x256xf32>
    %31 = vector.broadcast %30 : vector<1x256xf32> to vector<8x256xf32>
    %32 = vector.extract_strided_slice %5 {offsets = [0, 3], sizes = [8, 1], strides = [1, 1]} : vector<8x8xf32> to vector<8x1xf32>
    %33 = vector.broadcast %32 : vector<8x1xf32> to vector<8x256xf32>
    %34 = arith.mulf %33, %31 : vector<8x256xf32>
    %35 = arith.addf %28, %34 : vector<8x256xf32>
    %36 = vector.extract_strided_slice %4 {offsets = [4, 0], sizes = [1, 256], strides = [1, 1]} : vector<8x256xf32> to vector<1x256xf32>
    %37 = vector.shape_cast %36 : vector<1x256xf32> to vector<1x256xf32>
    %38 = vector.broadcast %37 : vector<1x256xf32> to vector<8x256xf32>
    %39 = vector.extract_strided_slice %5 {offsets = [0, 4], sizes = [8, 1], strides = [1, 1]} : vector<8x8xf32> to vector<8x1xf32>
    %40 = vector.broadcast %39 : vector<8x1xf32> to vector<8x256xf32>
    %41 = arith.mulf %40, %38 : vector<8x256xf32>
    %42 = arith.addf %35, %41 : vector<8x256xf32>
    %43 = vector.extract_strided_slice %4 {offsets = [5, 0], sizes = [1, 256], strides = [1, 1]} : vector<8x256xf32> to vector<1x256xf32>
    %44 = vector.shape_cast %43 : vector<1x256xf32> to vector<1x256xf32>
    %45 = vector.broadcast %44 : vector<1x256xf32> to vector<8x256xf32>
    %46 = vector.extract_strided_slice %5 {offsets = [0, 5], sizes = [8, 1], strides = [1, 1]} : vector<8x8xf32> to vector<8x1xf32>
    %47 = vector.broadcast %46 : vector<8x1xf32> to vector<8x256xf32>
    %48 = arith.mulf %47, %45 : vector<8x256xf32>
    %49 = arith.addf %42, %48 : vector<8x256xf32>
    %50 = vector.extract_strided_slice %4 {offsets = [6, 0], sizes = [1, 256], strides = [1, 1]} : vector<8x256xf32> to vector<1x256xf32>
    %51 = vector.shape_cast %50 : vector<1x256xf32> to vector<1x256xf32>
    %52 = vector.broadcast %51 : vector<1x256xf32> to vector<8x256xf32>
    %53 = vector.extract_strided_slice %5 {offsets = [0, 6], sizes = [8, 1], strides = [1, 1]} : vector<8x8xf32> to vector<8x1xf32>
    %54 = vector.broadcast %53 : vector<8x1xf32> to vector<8x256xf32>
    %55 = arith.mulf %54, %52 : vector<8x256xf32>
    %56 = arith.addf %49, %55 : vector<8x256xf32>
    %57 = vector.extract_strided_slice %4 {offsets = [7, 0], sizes = [1, 256], strides = [1, 1]} : vector<8x256xf32> to vector<1x256xf32>
    %58 = vector.shape_cast %57 : vector<1x256xf32> to vector<1x256xf32>
    %59 = vector.broadcast %58 : vector<1x256xf32> to vector<8x256xf32>
    %60 = vector.extract_strided_slice %5 {offsets = [0, 7], sizes = [8, 1], strides = [1, 1]} : vector<8x8xf32> to vector<8x1xf32>
    %61 = vector.broadcast %60 : vector<8x1xf32> to vector<8x256xf32>
    %62 = arith.mulf %61, %59 : vector<8x256xf32>
    %63 = arith.addf %56, %62 : vector<8x256xf32>
    %64 = vector.extract_strided_slice %63 {offsets = [0, 0], sizes = [8, 16], strides = [1, 1]} : vector<8x256xf32> to vector<8x16xf32>
    %c0_7 = arith.constant 0 : index
    %c19 = arith.constant 19 : index
    %65 = vector.load %arg4[%c0_7, %c19] : memref<8x324xf32, #tpu.memory_space<vmem>>, vector<8x16xf32>
    tpu.vector_store %arg4[%c0_7, %c19], %64 {strides = array<i32>} : memref<8x324xf32, #tpu.memory_space<vmem>>, vector<8x16xf32>,
    %66 = vector.extract_strided_slice %63 {offsets = [0, 16], sizes = [8, 16], strides = [1, 1]} : vector<8x256xf32> to vector<8x16xf32>
    %c0_8 = arith.constant 0 : index
    %c37 = arith.constant 37 : index
    %67 = vector.load %arg4[%c0_8, %c37] : memref<8x324xf32, #tpu.memory_space<vmem>>, vector<8x16xf32>
    tpu.vector_store %arg4[%c0_8, %c37], %66 {strides = array<i32>} : memref<8x324xf32, #tpu.memory_space<vmem>>, vector<8x16xf32>,
    %68 = vector.extract_strided_slice %63 {offsets = [0, 32], sizes = [8, 16], strides = [1, 1]} : vector<8x256xf32> to vector<8x16xf32>
    %c0_9 = arith.constant 0 : index
    %c55 = arith.constant 55 : index
    %69 = vector.load %arg4[%c0_9, %c55] : memref<8x324xf32, #tpu.memory_space<vmem>>, vector<8x16xf32>
    tpu.vector_store %arg4[%c0_9, %c55], %68 {strides = array<i32>} : memref<8x324xf32, #tpu.memory_space<vmem>>, vector<8x16xf32>,
    %70 = vector.extract_strided_slice %63 {offsets = [0, 48], sizes = [8, 16], strides = [1, 1]} : vector<8x256xf32> to vector<8x16xf32>
    %c0_10 = arith.constant 0 : index
    %c73 = arith.constant 73 : index
    %71 = vector.load %arg4[%c0_10, %c73] : memref<8x324xf32, #tpu.memory_space<vmem>>, vector<8x16xf32>
    tpu.vector_store %arg4[%c0_10, %c73], %70 {strides = array<i32>} : memref<8x324xf32, #tpu.memory_space<vmem>>, vector<8x16xf32>,
    %72 = vector.extract_strided_slice %63 {offsets = [0, 64], sizes = [8, 16], strides = [1, 1]} : vector<8x256xf32> to vector<8x16xf32>
    %c0_11 = arith.constant 0 : index
    %c91 = arith.constant 91 : index
    %73 = vector.load %arg4[%c0_11, %c91] : memref<8x324xf32, #tpu.memory_space<vmem>>, vector<8x16xf32>
    tpu.vector_store %arg4[%c0_11, %c91], %72 {strides = array<i32>} : memref<8x324xf32, #tpu.memory_space<vmem>>, vector<8x16xf32>,
    %74 = vector.extract_strided_slice %63 {offsets = [0, 80], sizes = [8, 16], strides = [1, 1]} : vector<8x256xf32> to vector<8x16xf32>
    %c0_12 = arith.constant 0 : index
    %c109 = arith.constant 109 : index
    %75 = vector.load %arg4[%c0_12, %c109] : memref<8x324xf32, #tpu.memory_space<vmem>>, vector<8x16xf32>
    tpu.vector_store %arg4[%c0_12, %c109], %74 {strides = array<i32>} : memref<8x324xf32, #tpu.memory_space<vmem>>, vector<8x16xf32>,
    %76 = vector.extract_strided_slice %63 {offsets = [0, 96], sizes = [8, 16], strides = [1, 1]} : vector<8x256xf32> to vector<8x16xf32>
    %c0_13 = arith.constant 0 : index
    %c127 = arith.constant 127 : index
    %77 = vector.load %arg4[%c0_13, %c127] : memref<8x324xf32, #tpu.memory_space<vmem>>, vector<8x16xf32>
    tpu.vector_store %arg4[%c0_13, %c127], %76 {strides = array<i32>} : memref<8x324xf32, #tpu.memory_space<vmem>>, vector<8x16xf32>,
    %78 = vector.extract_strided_slice %63 {offsets = [0, 112], sizes = [8, 16], strides = [1, 1]} : vector<8x256xf32> to vector<8x16xf32>
    %c0_14 = arith.constant 0 : index
    %c145 = arith.constant 145 : index
    %79 = vector.load %arg4[%c0_14, %c145] : memref<8x324xf32, #tpu.memory_space<vmem>>, vector<8x16xf32>
    tpu.vector_store %arg4[%c0_14, %c145], %78 {strides = array<i32>} : memref<8x324xf32, #tpu.memory_space<vmem>>, vector<8x16xf32>,
    %80 = vector.extract_strided_slice %63 {offsets = [0, 128], sizes = [8, 16], strides = [1, 1]} : vector<8x256xf32> to vector<8x16xf32>
    %c0_15 = arith.constant 0 : index
    %c163 = arith.constant 163 : index
    %81 = vector.load %arg4[%c0_15, %c163] : memref<8x324xf32, #tpu.memory_space<vmem>>, vector<8x16xf32>
    tpu.vector_store %arg4[%c0_15, %c163], %80 {strides = array<i32>} : memref<8x324xf32, #tpu.memory_space<vmem>>, vector<8x16xf32>,
    %82 = vector.extract_strided_slice %63 {offsets = [0, 144], sizes = [8, 16], strides = [1, 1]} : vector<8x256xf32> to vector<8x16xf32>
    %c0_16 = arith.constant 0 : index
    %c181 = arith.constant 181 : index
    %83 = vector.load %arg4[%c0_16, %c181] : memref<8x324xf32, #tpu.memory_space<vmem>>, vector<8x16xf32>
    tpu.vector_store %arg4[%c0_16, %c181], %82 {strides = array<i32>} : memref<8x324xf32, #tpu.memory_space<vmem>>, vector<8x16xf32>,
    %84 = vector.extract_strided_slice %63 {offsets = [0, 160], sizes = [8, 16], strides = [1, 1]} : vector<8x256xf32> to vector<8x16xf32>
    %c0_17 = arith.constant 0 : index
    %c199 = arith.constant 199 : index
    %85 = vector.load %arg4[%c0_17, %c199] : memref<8x324xf32, #tpu.memory_space<vmem>>, vector<8x16xf32>
    tpu.vector_store %arg4[%c0_17, %c199], %84 {strides = array<i32>} : memref<8x324xf32, #tpu.memory_space<vmem>>, vector<8x16xf32>,
    %86 = vector.extract_strided_slice %63 {offsets = [0, 176], sizes = [8, 16], strides = [1, 1]} : vector<8x256xf32> to vector<8x16xf32>
    %c0_18 = arith.constant 0 : index
    %c217 = arith.constant 217 : index
    %87 = vector.load %arg4[%c0_18, %c217] : memref<8x324xf32, #tpu.memory_space<vmem>>, vector<8x16xf32>
    tpu.vector_store %arg4[%c0_18, %c217], %86 {strides = array<i32>} : memref<8x324xf32, #tpu.memory_space<vmem>>, vector<8x16xf32>,
    %88 = vector.extract_strided_slice %63 {offsets = [0, 192], sizes = [8, 16], strides = [1, 1]} : vector<8x256xf32> to vector<8x16xf32>
    %c0_19 = arith.constant 0 : index
    %c235 = arith.constant 235 : index
    %89 = vector.load %arg4[%c0_19, %c235] : memref<8x324xf32, #tpu.memory_space<vmem>>, vector<8x16xf32>
    tpu.vector_store %arg4[%c0_19, %c235], %88 {strides = array<i32>} : memref<8x324xf32, #tpu.memory_space<vmem>>, vector<8x16xf32>,
    %90 = vector.extract_strided_slice %63 {offsets = [0, 208], sizes = [8, 16], strides = [1, 1]} : vector<8x256xf32> to vector<8x16xf32>
    %c0_20 = arith.constant 0 : index
    %c253 = arith.constant 253 : index
    %91 = vector.load %arg4[%c0_20, %c253] : memref<8x324xf32, #tpu.memory_space<vmem>>, vector<8x16xf32>
    tpu.vector_store %arg4[%c0_20, %c253], %90 {strides = array<i32>} : memref<8x324xf32, #tpu.memory_space<vmem>>, vector<8x16xf32>,
    %92 = vector.extract_strided_slice %63 {offsets = [0, 224], sizes = [8, 16], strides = [1, 1]} : vector<8x256xf32> to vector<8x16xf32>
    %c0_21 = arith.constant 0 : index
    %c271 = arith.constant 271 : index
    %93 = vector.load %arg4[%c0_21, %c271] : memref<8x324xf32, #tpu.memory_space<vmem>>, vector<8x16xf32>
    tpu.vector_store %arg4[%c0_21, %c271], %92 {strides = array<i32>} : memref<8x324xf32, #tpu.memory_space<vmem>>, vector<8x16xf32>,
    %94 = vector.extract_strided_slice %63 {offsets = [0, 240], sizes = [8, 16], strides = [1, 1]} : vector<8x256xf32> to vector<8x16xf32>
    %c0_22 = arith.constant 0 : index
    %c289 = arith.constant 289 : index
    %95 = vector.load %arg4[%c0_22, %c289] : memref<8x324xf32, #tpu.memory_space<vmem>>, vector<8x16xf32>
    tpu.vector_store %arg4[%c0_22, %c289], %94 {strides = array<i32>} : memref<8x324xf32, #tpu.memory_space<vmem>>, vector<8x16xf32>,
    return
  }
  func.func @transform_0(%arg0: i32) -> (i32, i32) {
    %c0_i32 = arith.constant 0 : i32
    %c0_i32_0 = arith.constant 0 : i32
    %c0_i32_1 = arith.constant 0 : i32
    return %c0_i32, %c0_i32_0 : i32, i32
  }
  func.func @transform_1(%arg0: i32) -> (i32, i32) {
    %c0_i32 = arith.constant 0 : i32
    %c0_i32_0 = arith.constant 0 : i32
    %c0_i32_1 = arith.constant 0 : i32
    return %c0_i32, %c0_i32_0 : i32, i32
  }
  func.func @transform_2(%arg0: i32) -> (i32, i32) {
    %c0_i32 = arith.constant 0 : i32
    %c0_i32_0 = arith.constant 0 : i32
    %c0_i32_1 = arith.constant 0 : i32
    return %c0_i32, %c0_i32_0 : i32, i32
  }
  func.func @transform_3(%arg0: i32) -> (i32, i32) {
    %c0_i32 = arith.constant 0 : i32
    %c0_i32_0 = arith.constant 0 : i32
    %c0_i32_1 = arith.constant 0 : i32
    return %c0_i32, %c0_i32_0 : i32, i32
  }
}

</mosaic_0001>

<bundles_post_ra>
// kernel: tile.8
= control target key start
LH: loop header
LB: loop body
LE: loop exit
PB: predicated region body
PF: predicated region fallthrough
CT: control target
= control target key end

     0   :  { %s22_s0 = inlined_call_operand.vmem [shape: f32[4], index: 0, kind: input, shape index: {}]   ;;  %s23_s1 = inlined_call_operand.vmem [shape: f32[2,4], index: 1, kind: output, shape index: {}]  }
   0x1   :  { %v4_v0 = vld [vmem:[%s22_s0] ss:$0 sm:$0xff] }
   0x2   :  { %5 = vst [vmem:[%s23_s1] sm:$0x3] %v4_v0 }

// kernel: tile.0
= control target key start
LH: loop header
LB: loop body
LE: loop exit
PB: predicated region body
PF: predicated region fallthrough
CT: control target
= control target key end

     0   :  { %s34_s8 = smov 125   ;;  %s35_s9 = smov 126   ;;  %vm7_vm0 = vcmask 7168   ;;  %s61_s0 = inlined_call_operand.vmem [shape: f32[2,4], index: 0, kind: input, shape index: {}]   ;;  %s62_s1 = inlined_call_operand.vmem [shape: f32[8,1], index: 1, kind: output, shape index: {}]  }
   0x1   :  { %v4_v0 = vld [vmem:[%s61_s0] sm:$0x3]  ;;  %s33_s0 = smov 127  }
   0x2   :  { %5 = vst [vmem:[#allocation0] sm:$0x3] %v4_v0 }
   0x9   :  { %v9_v1 = vld [vmem:[#allocation0] sm:$0x3]  }
   0xa   :  { %v21_v2 = vld [vmem:[#allocation0] sm:$0x3]   ;;  %10 = vrot.lane.b32.xlu0 %v9_v1, %s33_s0 }
   0xb   :  { %22 = vrot.lane.b32.xlu1 %v21_v2, %s34_s8  ;;  %v15_v3 = vld [vmem:[#allocation0] sm:$0x3]  }
   0xc   :  { %v6_v4 = vld [vmem:[#allocation0] sm:$0x3]  }
   0xd   :  { %8 = vst.msk [vmem:[%s62_s1] ss:$4 sm:$0x3] %vm7_vm0, %v6_v4  }
  0x12   :  { %16 = vrot.lane.b32.xlu0 %v15_v3, %s35_s9 }
  0x7c   :  { %v11_v5 = vpop.permute.xlu0 %10  }
  0x7d   :  { %v23_v6 = vpop.permute.xlu1 %22   ;;  %27 = vst.msk [vmem:[%s62_s1 + $0x1] ss:$4 sm:$0x3] %vm7_vm0, %v11_v5  }
  0x7e   :  { %29 = vst.msk [vmem:[%s62_s1 + $0x3] ss:$4 sm:$0x3] %vm7_vm0, %v23_v6  }
  0x84   :  { %v17_v7 = vpop.permute.xlu0 %16  }
  0x85   :  { %28 = vst.msk [vmem:[%s62_s1 + $0x2] ss:$4 sm:$0x3] %vm7_vm0, %v17_v7  }

// kernel: model_forward.1
= control target key start
LH: loop header
LB: loop body
LE: loop exit
PB: predicated region body
PF: predicated region fallthrough
CT: control target
= control target key end

     0   :  { %v231_v0 = vmov 0   ;;  %v232_v1 = vmov 1   ;;  %v233_v3 = vmov 3   ;;  %v234_v5 = vmov 2   ;;  %s239_s23 = smov 33   ;;  %s240_s24 = smov 31   ;;  %s360_s1 = inlined_call_operand.vmem [shape: f32[8,8], index: 1, kind: input, shape index: {}]   ;;  %s361_s2 = inlined_call_operand.vmem [shape: f32[8,1], index: 2, kind: input, shape index: {}]   ;;  %s362_s0 = inlined_call_operand.vmem [shape: f32[8,256], index: 0, kind: input, shape index: {}]   ;;  %s363_s3 = inlined_call_operand.vmem [shape: f32[8,324], index: 3, kind: output, shape index: {}]  }
   0x1   :  { %222 = vset.pattern.permute.xlu0 %v231_v0  ;;  %223 = vset.pattern.permute.xlu1 %v232_v1  ;;  %v26_v2 = vld [vmem:[%s360_s1] sm:$0xff]  ;;  %v235_v6 = vmov 4   ;;  %v236_v7 = vmov 5   ;;  %v237_v8 = vmov 6   ;;  %v238_v9 = vmov 7   ;;  %v287_v13 = vld [vmem:[%s362_s0 + $0x8] sm:$0xff] }
   0x2   :  { %31 = vperm.xlu0 %222, %v26_v2   ;;  %41 = vperm.xlu1 %223, %v26_v2   ;;  %v14_v4 = vld [vmem:[%s361_s2] sm:$0xff]  ;;  %v28_v16 = vperm.slane %v287_v13, 0  ;;  %v39_v18 = vperm.slane %v287_v13, 1  ;;  %v49_v20 = vperm.slane %v287_v13, 2  ;;  %vm22_vm0 = vcmask 556032   ;;  %s241_s25 = smov 19  }
   0x3   :  { %225 = vset.pattern.permute.xlu2 %v233_v3  ;;  %v24_v12 = vld [vmem:[%s362_s0] sm:$0xff]  ;;  %v59_v31 = vperm.slane %v287_v13, 3  ;;  %v69_v41 = vperm.slane %v287_v13, 4  ;;  %v79_v47 = vperm.slane %v287_v13, 5  ;;  %v89_v55 = vperm.slane %v287_v13, 6  ;;  %s242_s26 = smov 23  }
   0x4   :  { %61 = vperm.xlu2 %225, %v26_v2   ;;  %v27_v15 = vperm.slane %v24_v12, 0  ;;  %v38_v17 = vperm.slane %v24_v12, 1  ;;  %v48_v19 = vperm.slane %v24_v12, 2  ;;  %v58_v24 = vperm.slane %v24_v12, 3  ;;  %s243_s27 = smov 35   ;;  %s244_s28 = smov 21  }
   0x5   :  { %v68_v36 = vperm.slane %v24_v12, 4  ;;  %v78_v42 = vperm.slane %v24_v12, 5  ;;  %v88_v45 = vperm.slane %v24_v12, 6  ;;  %v98_v48 = vperm.slane %v24_v12, 7  ;;  %s245_s29 = smov 39   ;;  %s246_s30 = smov 25  }
   0x6   :  { %v99_v0 = vperm.slane %v287_v13, 7  ;;  %s247_s4 = smov 37   ;;  %s248_s5 = smov 45   ;;  %vm144_vm1 = vcmask 121856   ;;  %vm149_vm2 = vcmask 269448   ;;  %vm112_vm3 = vcmask 285848  }
   0x7   :  { %s249_s6 = smov 41   ;;  %s250_s7 = smov 27   ;;  %vm155_vm4 = vcmask 417048   ;;  %vm117_vm5 = vcmask 433448   ;;  %vm122_vm6 = vcmask 581048   ;;  %vm127_vm7 = vcmask 728648  }
   0x8   :  { %s251_s8 = smov 47   ;;  %s252_s9 = smov 43   ;;  %vm160_vm8 = vcmask 564648   ;;  %vm165_vm9 = vcmask 712248   ;;  %vm170_vm10 = vcmask 859848   ;;  %vm175_vm11 = vcmask 1007448  }
   0x9   :  { %s253_s10 = smov 29   ;;  %s254_s11 = smov 49   ;;  %vm180_vm12 = vcmask 1048552   ;;  %vm182_vm13 = vcmask 105472   ;;  %vm132_vm14 = vcmask 876248   ;;  %vm187_vm15 = vcmask 253048  }
   0xa   :  { %17 = vperm.xlu0 %222, %v14_v4   ;;  %224 = vset.pattern.permute.xlu1 %v234_v5 }
   0xb   :  { %51 = vperm.xlu1 %224, %v26_v2  }
   0xc   :  { %226 = vset.pattern.permute.xlu2 %v235_v6 }
   0xd   :  { %71 = vperm.xlu2 %226, %v26_v2  }
  0x12   :  { %227 = vset.pattern.permute.xlu0 %v236_v7 }
  0x13   :  { %81 = vperm.xlu0 %227, %v26_v2   ;;  %228 = vset.pattern.permute.xlu1 %v237_v8 }
  0x14   :  { %91 = vperm.xlu1 %228, %v26_v2  }
  0x15   :  { %229 = vset.pattern.permute.xlu2 %v238_v9 }
  0x16   :  { %101 = vperm.xlu2 %229, %v26_v2  }
  0x1b   :  { %230 = vset.pattern.permute.xlu0 %v238_v9 }
  0x5e   :  { %v62_v10 = vpop.permute.xlu2 %61 }
  0x5f   :  { %v64_v37 = vmul.f32 %v62_v10, %v58_v24  ;;  %v65_v40 = vmul.f32 %v62_v10, %v59_v31 }
  0x67   :  { %v72_v23 = vpop.permute.xlu2 %71 }
  0x68   :  { %v74_v44 = vmul.f32 %v72_v23, %v68_v36  ;;  %v75_v52 = vmul.f32 %v72_v23, %v69_v41 }
  0x70   :  { %v102_v51 = vpop.permute.xlu2 %101 }
  0x71   :  { %v104_v60 = vmul.f32 %v102_v51, %v98_v48  ;;  %v105_v3 = vmul.f32 %v102_v51, %v99_v0 }
  0x74   :  { %v32_v11 = vpop.permute.xlu0 %31  ;;  %v42_v14 = vpop.permute.xlu1 %41 }
  0x75   :  { %v34_v21 = vmul.f32 %v32_v11, %v27_v15  ;;  %v35_v22 = vmul.f32 %v32_v11, %v28_v16  ;;  %v44_v26 = vmul.f32 %v42_v14, %v38_v17  ;;  %v45_v27 = vmul.f32 %v42_v14, %v39_v18 }
  0x7c   :  { %v18_v25 = vpop.permute.xlu0 %17 }
  0x7d   :  { %v52_v28 = vpop.permute.xlu1 %51  ;;  %v36_v29 = vadd.f32 %v34_v21, %v18_v25  ;;  %v37_v30 = vadd.f32 %v35_v22, %v18_v25  ;;  %21 = vst [vmem:[%s363_s3 + $0x8] sm:$0xff] %v18_v25 }
  0x7e   :  { %v54_v32 = vmul.f32 %v52_v28, %v48_v19  ;;  %v55_v33 = vmul.f32 %v52_v28, %v49_v20  ;;  %20 = vst [vmem:[%s363_s3] sm:$0xff] %v18_v25 }
  0x7f   :  { %v46_v34 = vadd.f32 %v44_v26, %v36_v29  ;;  %v47_v35 = vadd.f32 %v45_v27, %v37_v30  ;;  %23 = vst.msk [vmem:[%s363_s3 + $0x10] sm:$0xff] %vm22_vm0, %v18_v25  ;;  %vm137_vm0 = vcmask 1023848  }
  0x81   :  { %v56_v38 = vadd.f32 %v54_v32, %v46_v34  ;;  %v57_v39 = vadd.f32 %v55_v33, %v47_v35 }
  0x83   :  { %v66_v43 = vadd.f32 %v64_v37, %v56_v38  ;;  %v67_v46 = vadd.f32 %v65_v40, %v57_v39 }
  0x85   :  { %v76_v49 = vadd.f32 %v74_v44, %v66_v43  ;;  %v82_v50 = vpop.permute.xlu0 %81  ;;  %v77_v57 = vadd.f32 %v75_v52, %v67_v46 }
  0x86   :  { %v84_v53 = vmul.f32 %v82_v50, %v78_v42  ;;  %v92_v54 = vpop.permute.xlu1 %91  ;;  %v85_v58 = vmul.f32 %v82_v50, %v79_v47 }
  0x87   :  { %v94_v56 = vmul.f32 %v92_v54, %v88_v45  ;;  %v95_v63 = vmul.f32 %v92_v54, %v89_v55 }
  0x88   :  { %v86_v59 = vadd.f32 %v84_v53, %v76_v49  ;;  %v87_v62 = vadd.f32 %v85_v58, %v77_v57 }
  0x8a   :  { %v96_v61 = vadd.f32 %v94_v56, %v86_v59  ;;  %v97_v2 = vadd.f32 %v95_v63, %v87_v62 }
  0x8c   :  { %v106_v1 = vadd.f32 %v104_v60, %v96_v61  ;;  %v107_v4 = vadd.f32 %v105_v3, %v97_v2 }
  0x8e   :  { %146 = vrot.lane.b32.xlu0 %v106_v1, %s239_s23  ;;  %139 = vrot.lane.b32.xlu2 %v106_v1, %s240_s24 }
  0x8f   :  { %109 = vrot.lane.b32.xlu1 %v106_v1, %s241_s25 }
  0x96   :  { %119 = vrot.lane.b32.xlu0 %v106_v1, %s242_s26  ;;  %152 = vrot.lane.b32.xlu2 %v107_v4, %s243_s27 }
  0x97   :  { %114 = vrot.lane.b32.xlu1 %v106_v1, %s244_s28 }
  0x9e   :  { %162 = vrot.lane.b32.xlu0 %v107_v4, %s245_s29  ;;  %124 = vrot.lane.b32.xlu2 %v106_v1, %s246_s30 }
  0x9f   :  { %157 = vrot.lane.b32.xlu1 %v107_v4, %s247_s4 }
  0xa6   :  { %177 = vrot.lane.b32.xlu0 %v107_v4, %s248_s5  ;;  %167 = vrot.lane.b32.xlu2 %v107_v4, %s249_s6 }
  0xa7   :  { %129 = vrot.lane.b32.xlu1 %v106_v1, %s250_s7 }
  0xae   :  { %184 = vrot.lane.b32.xlu0 %v107_v4, %s251_s8  ;;  %172 = vrot.lane.b32.xlu2 %v107_v4, %s252_s9 }
  0xaf   :  { %134 = vrot.lane.b32.xlu1 %v106_v1, %s253_s10 }
  0xb7   :  { %189 = vrot.lane.b32.xlu1 %v107_v4, %s254_s11 }
  0xe8   :  { %v140_v5 = vpop.permute.xlu2 %139 }
  0xe9   :  { %145 = vst.msk [vmem:[%s363_s3 + $0x8] sm:$0xff] %vm144_vm1, %v140_v5  ;;  %vm142_vm1 = vcmask 1048568  }
  0xf0   :  { %v153_v6 = vpop.permute.xlu2 %152 }
  0xf8   :  { %v125_v7 = vpop.permute.xlu2 %124 }
 0x100   :  { %v147_v8 = vpop.permute.xlu0 %146  ;;  %v168_v12 = vpop.permute.xlu2 %167 }
 0x101   :  { %150 = vst.msk [vmem:[%s363_s3 + $0x8] sm:$0xff] %vm149_vm2, %v147_v8  ;;  %v110_v9 = vpop.permute.xlu1 %109  ;;  %vm192_vm2 = vcmask 400648  }
 0x102   :  { %113 = vst.msk [vmem:[%s363_s3] sm:$0xff] %vm112_vm3, %v110_v9 }
 0x103   :  { %156 = vst.msk [vmem:[%s363_s3 + $0x8] sm:$0xff] %vm155_vm4, %v153_v6 }
 0x108   :  { %v120_v10 = vpop.permute.xlu0 %119  ;;  %v173_v15 = vpop.permute.xlu2 %172 }
 0x109   :  { %v115_v11 = vpop.permute.xlu1 %114 }
 0x10a   :  { %118 = vst.msk [vmem:[%s363_s3] sm:$0xff] %vm117_vm5, %v115_v11 }
 0x10b   :  { %123 = vst.msk [vmem:[%s363_s3] sm:$0xff] %vm122_vm6, %v120_v10 }
 0x10c   :  { %128 = vst.msk [vmem:[%s363_s3] sm:$0xff] %vm127_vm7, %v125_v7 }
 0x110   :  { %v163_v13 = vpop.permute.xlu0 %162 }
 0x111   :  { %v158_v14 = vpop.permute.xlu1 %157 }
 0x112   :  { %161 = vst.msk [vmem:[%s363_s3 + $0x8] sm:$0xff] %vm160_vm8, %v158_v14 }
 0x113   :  { %166 = vst.msk [vmem:[%s363_s3 + $0x8] sm:$0xff] %vm165_vm9, %v163_v13 }
 0x114   :  { %171 = vst.msk [vmem:[%s363_s3 + $0x8] sm:$0xff] %vm170_vm10, %v168_v12 }
 0x115   :  { %176 = vst.msk [vmem:[%s363_s3 + $0x8] sm:$0xff] %vm175_vm11, %v173_v15 }
 0x118   :  { %v178_v16 = vpop.permute.xlu0 %177 }
 0x119   :  { %181 = vst.msk [vmem:[%s363_s3 + $0x8] sm:$0xff] %vm180_vm12, %v178_v16  ;;  %v130_v17 = vpop.permute.xlu1 %129 }
 0x11a   :  { %183 = vst.msk [vmem:[%s363_s3 + $0x10] sm:$0xff] %vm182_vm13, %v178_v16 }
 0x11b   :  { %133 = vst.msk [vmem:[%s363_s3] sm:$0xff] %vm132_vm14, %v130_v17 }
 0x120   :  { %v185_v18 = vpop.permute.xlu0 %184 }
 0x121   :  { %188 = vst.msk [vmem:[%s363_s3 + $0x10] sm:$0xff] %vm187_vm15, %v185_v18  ;;  %v135_v19 = vpop.permute.xlu1 %134 }
 0x122   :  { %138 = vst.msk [vmem:[%s363_s3] sm:$0xff] %vm137_vm0, %v135_v19 }
 0x123   :  { %143 = vst.msk [vmem:[%s363_s3] sm:$0xff] %vm142_vm1, %v140_v5 }
 0x129   :  { %v190_v20 = vpop.permute.xlu1 %189 }
 0x12a   :  { %193 = vst.msk [vmem:[%s363_s3 + $0x10] sm:$0xff] %vm192_vm2, %v190_v20 }

</bundles_post_ra>
